<compile_context>
chip_gen: v7x
topology: tpu7x:2x2x1
jax: 0.10.0
libtpu: 0.0.40
codegen_flags: <defaults>
</compile_context>

<pallas_src>
import jax
import jax.numpy as jnp
from jax.experimental import pallas as pl
from jax.experimental.pallas import tpu as pltpu


def critic_kernel(x_ref, w1_ref, b1_ref, w2_ref, b2_ref, w3_ref, b3_ref, out_ref):
    # linear1 + ReLU (MXU)
    h1 = jnp.dot(x_ref[...], w1_ref[...], preferred_element_type=jnp.float32)
    h1 = jnp.maximum(h1 + b1_ref[...], 0.0)
    # linear2 + ReLU (MXU)
    h2 = jnp.dot(h1, w2_ref[...], preferred_element_type=jnp.float32)
    h2 = jnp.maximum(h2 + b2_ref[...], 0.0)
    # value head: N=1 matmul replaced by VPU multiply + cross-lane reduction.
    # w3_ref is a [1, 64] row; b3_ref is an SMEM scalar.
    v = jnp.sum(h2 * w3_ref[...], axis=-1, keepdims=True)
    out_ref[...] = (v + b3_ref[0, 0]).astype(out_ref.dtype)


def critic_forward(state, params, tile_b=4096):
    """state: [B, state_size] float32 -> value: [B, 1] float32."""
    w1, b1, w2, b2, w3, b3 = params
    B, S = state.shape
    H1 = w1.shape[1]   # 32
    H2 = w2.shape[1]   # 64

    # Value-head weight as a lane-dense [1, H2] row (done in the wrapper, not the kernel).
    w3_row = w3.reshape(1, H2)

    # Tile the batch: TILE_B must be a multiple of 8 (sublanes); pad B up to a multiple
    # of TILE_B. Default 4096 is safe on v5e/v6e/v7x VMEM; v5e/v6e can pass tile_b=16384+.
    TILE_B = min(int(tile_b), max(8, ((B + 7) // 8) * 8))
    TILE_B = ((TILE_B + 7) // 8) * 8
    padded_B = ((B + TILE_B - 1) // TILE_B) * TILE_B
    if padded_B != B:
        state = jnp.pad(state, ((0, padded_B - B), (0, 0)))

    grid = (pl.cdiv(padded_B, TILE_B),)

    const = lambda i: (0, 0)  # weights/biases: same block every grid step (stay resident)

    out = pl.pallas_call(
        critic_kernel,
        out_shape=jax.ShapeDtypeStruct((padded_B, 1), jnp.float32),
        grid=grid,
        in_specs=[
            pl.BlockSpec((TILE_B, S), lambda i: (i, 0)),          # state tile (pipelined)
            pl.BlockSpec((S, H1), const),                         # w1
            pl.BlockSpec((1, H1), const),                         # b1
            pl.BlockSpec((H1, H2), const),                        # w2
            pl.BlockSpec((1, H2), const),                         # b2
            pl.BlockSpec((1, H2), const),                         # w3 as [1, 64] row
            pl.BlockSpec((1, 1), const,
                         memory_space=pltpu.MemorySpace.SMEM),    # b3 scalar in SMEM
        ],
        out_specs=pl.BlockSpec((TILE_B, 1), lambda i: (i, 0)),
        compiler_params=pltpu.CompilerParams(
            dimension_semantics=("parallel",),  # v7x: shard batch tiles across both TCs
        ),
    )(state, w1, b1, w2, b2, w3_row, b3)

    return out[:B]
    # NOTE: further wins (bf16 inputs, 8-samples-per-128-lane packing, lane-dense
    # [1, TILE_B] output slab) are possible but kept out to preserve exact f32
    # PyTorch semantics and the [B, 1] output contract.


def init_params(key, state_size):
    """Deterministic init mirroring nn.Linear shapes (weights stored as [in, out])."""
    def linear_init(k, fan_in, fan_out):
        kw, kb = jax.random.split(k)
        bound = 1.0 / jnp.sqrt(jnp.float32(fan_in))
        w = jax.random.uniform(kw, (fan_in, fan_out), jnp.float32, -bound, bound)
        b = jax.random.uniform(kb, (1, fan_out), jnp.float32, -bound, bound)
        return w, b

    k1, k2, k3 = jax.random.split(key, 3)
    w1, b1 = linear_init(k1, state_size, 32)   # linear1: state_size -> 32
    w2, b2 = linear_init(k2, 32, 64)           # linear2: 32 -> 64
    w3, b3 = linear_init(k3, 64, 1)            # linear3: 64 -> 1
    return (w1, b1, w2, b2, w3, b3)


def _reference(state, params):
    w1, b1, w2, b2, w3, b3 = params
    h = jnp.maximum(state @ w1 + b1, 0.0)
    h = jnp.maximum(h @ w2 + b2, 0.0)
    return h @ w3 + b3


if __name__ == "__main__":
    key = jax.random.PRNGKey(0)
    k_params, k_state, k_state_big = jax.random.split(key, 3)

    batch = 8
    state_size = 16
    action_size = 4  # unused by Critic.forward, kept for interface parity

    params = init_params(k_params, state_size)

    # Small smoke test (single grid step).
    state = jax.random.normal(k_state, (batch, state_size), dtype=jnp.float32)
    value = jax.block_until_ready(critic_forward(state, params))
    ref = _reference(state, params)
    assert value.shape == (batch, 1)
    assert jnp.allclose(value, ref, atol=1e-5, rtol=1e-5)

    # Multi-tile test: exercises grid pipelining + batch padding (B not multiple of tile).
    big_batch = 1000
    state_big = jax.random.normal(k_state_big, (big_batch, state_size), dtype=jnp.float32)
    value_big = jax.block_until_ready(critic_forward(state_big, params, tile_b=256))
    ref_big = _reference(state_big, params)
    assert value_big.shape == (big_batch, 1)
    assert jnp.allclose(value_big, ref_big, atol=1e-5, rtol=1e-5)

    print("KERNEL_OK")
</pallas_src>

<mosaic_0001>
module attributes {stable_mosaic.version = 11 : i64} {
  func.func @critic_kernel(%arg0: i32, %arg1: memref<8x16xf32, #tpu.memory_space<vmem>>, %arg2: memref<16x32xf32, #tpu.memory_space<vmem>>, %arg3: memref<1x32xf32, #tpu.memory_space<vmem>>, %arg4: memref<32x64xf32, #tpu.memory_space<vmem>>, %arg5: memref<1x64xf32, #tpu.memory_space<vmem>>, %arg6: memref<1x64xf32, #tpu.memory_space<vmem>>, %arg7: memref<1x1xf32, #tpu.memory_space<smem>>, %arg8: memref<8x1xf32, #tpu.memory_space<vmem>>) attributes {dimension_semantics = [#tpu.dimension_semantics<parallel>], iteration_bounds = array<i64: 1>, scalar_prefetch = 0 : i64, scratch_operands = 0 : i64, tpu.core_type = #tpu.core_type<tc>, window_params = [{transform_indices = @transform_0, window_bounds = array<i64: 8, 16>}, {pipeline_mode = #tpu.pipeline_mode<synchronous>, transform_indices = @transform_1, window_bounds = array<i64: 16, 32>}, {pipeline_mode = #tpu.pipeline_mode<synchronous>, transform_indices = @transform_2, window_bounds = array<i64: 1, 32>}, {pipeline_mode = #tpu.pipeline_mode<synchronous>, transform_indices = @transform_3, window_bounds = array<i64: 32, 64>}, {pipeline_mode = #tpu.pipeline_mode<synchronous>, transform_indices = @transform_4, window_bounds = array<i64: 1, 64>}, {pipeline_mode = #tpu.pipeline_mode<synchronous>, transform_indices = @transform_5, window_bounds = array<i64: 1, 64>}, {transform_indices = @transform_6, window_bounds = array<i64: 1, 1>}, {transform_indices = @transform_7, window_bounds = array<i64: 8, 1>}]} {
    %c0 = arith.constant 0 : index
    %c0_0 = arith.constant 0 : index
    %0 = vector.load %arg1[%c0, %c0_0] : memref<8x16xf32, #tpu.memory_space<vmem>>, vector<8x16xf32>
    %c0_1 = arith.constant 0 : index
    %c0_2 = arith.constant 0 : index
    %1 = vector.load %arg2[%c0_1, %c0_2] : memref<16x32xf32, #tpu.memory_space<vmem>>, vector<16x32xf32>
    %cst = arith.constant dense<0.000000e+00> : vector<8x32xf32>
    %2 = tpu.matmul %0, %1, %cst {dimension_numbers = #tpu.dot_dimension_numbers<[1], [0], [0], [1], [0, 0, 1, 1], [], []>} : vector<8x16xf32>, vector<16x32xf32>, vector<8x32xf32> -> vector<8x32xf32>
    %c0_3 = arith.constant 0 : index
    %c0_4 = arith.constant 0 : index
    %3 = vector.load %arg3[%c0_3, %c0_4] : memref<1x32xf32, #tpu.memory_space<vmem>>, vector<1x32xf32>
    %4 = vector.broadcast %3 : vector<1x32xf32> to vector<8x32xf32>
    %5 = arith.addf %2, %4 : vector<8x32xf32>
    %cst_5 = arith.constant 0.000000e+00 : f32
    %6 = vector.broadcast %cst_5 : f32 to vector<8x32xf32>
    %7 = arith.maximumf %5, %6 : vector<8x32xf32>
    %c0_6 = arith.constant 0 : index
    %c0_7 = arith.constant 0 : index
    %8 = vector.load %arg4[%c0_6, %c0_7] : memref<32x64xf32, #tpu.memory_space<vmem>>, vector<32x64xf32>
    %cst_8 = arith.constant dense<0.000000e+00> : vector<8x64xf32>
    %9 = tpu.matmul %7, %8, %cst_8 {dimension_numbers = #tpu.dot_dimension_numbers<[1], [0], [0], [1], [0, 0, 1, 1], [], []>} : vector<8x32xf32>, vector<32x64xf32>, vector<8x64xf32> -> vector<8x64xf32>
    %c0_9 = arith.constant 0 : index
    %c0_10 = arith.constant 0 : index
    %10 = vector.load %arg5[%c0_9, %c0_10] : memref<1x64xf32, #tpu.memory_space<vmem>>, vector<1x64xf32>
    %11 = vector.broadcast %10 : vector<1x64xf32> to vector<8x64xf32>
    %12 = arith.addf %9, %11 : vector<8x64xf32>
    %cst_11 = arith.constant 0.000000e+00 : f32
    %13 = vector.broadcast %cst_11 : f32 to vector<8x64xf32>
    %14 = arith.maximumf %12, %13 : vector<8x64xf32>
    %c0_12 = arith.constant 0 : index
    %c0_13 = arith.constant 0 : index
    %15 = vector.load %arg6[%c0_12, %c0_13] : memref<1x64xf32, #tpu.memory_space<vmem>>, vector<1x64xf32>
    %16 = vector.broadcast %15 : vector<1x64xf32> to vector<8x64xf32>
    %17 = arith.mulf %14, %16 : vector<8x64xf32>
    %cst_14 = arith.constant dense<0.000000e+00> : vector<8xf32>
    %18 = vector.multi_reduction <add>, %17, %cst_14 [1] : vector<8x64xf32> to vector<8xf32>
    %19 = vector.shape_cast %18 : vector<8xf32> to vector<8x1xf32>
    %c0_15 = arith.constant 0 : index
    %c0_16 = arith.constant 0 : index
    %20 = memref.load %arg7[%c0_15, %c0_16] : memref<1x1xf32, #tpu.memory_space<smem>>
    %21 = vector.broadcast %20 : f32 to vector<8x1xf32>
    %22 = arith.addf %19, %21 : vector<8x1xf32>
    %c0_17 = arith.constant 0 : index
    %c0_18 = arith.constant 0 : index
    %23 = vector.load %arg8[%c0_17, %c0_18] : memref<8x1xf32, #tpu.memory_space<vmem>>, vector<8x1xf32>
    tpu.vector_store %arg8[%c0_17, %c0_18], %22 {strides = array<i32>} : memref<8x1xf32, #tpu.memory_space<vmem>>, vector<8x1xf32>,
    return
  }
  func.func @transform_0(%arg0: i32) -> (i32, i32) {
    %c0_i32 = arith.constant 0 : i32
    %c0_i32_0 = arith.constant 0 : i32
    return %arg0, %c0_i32 : i32, i32
  }
  func.func @transform_1(%arg0: i32) -> (i32, i32) {
    %c0_i32 = arith.constant 0 : i32
    %c0_i32_0 = arith.constant 0 : i32
    %c0_i32_1 = arith.constant 0 : i32
    return %c0_i32, %c0_i32_0 : i32, i32
  }
  func.func @transform_2(%arg0: i32) -> (i32, i32) {
    %c0_i32 = arith.constant 0 : i32
    %c0_i32_0 = arith.constant 0 : i32
    %c0_i32_1 = arith.constant 0 : i32
    return %c0_i32, %c0_i32_0 : i32, i32
  }
  func.func @transform_3(%arg0: i32) -> (i32, i32) {
    %c0_i32 = arith.constant 0 : i32
    %c0_i32_0 = arith.constant 0 : i32
    %c0_i32_1 = arith.constant 0 : i32
    return %c0_i32, %c0_i32_0 : i32, i32
  }
  func.func @transform_4(%arg0: i32) -> (i32, i32) {
    %c0_i32 = arith.constant 0 : i32
    %c0_i32_0 = arith.constant 0 : i32
    %c0_i32_1 = arith.constant 0 : i32
    return %c0_i32, %c0_i32_0 : i32, i32
  }
  func.func @transform_5(%arg0: i32) -> (i32, i32) {
    %c0_i32 = arith.constant 0 : i32
    %c0_i32_0 = arith.constant 0 : i32
    %c0_i32_1 = arith.constant 0 : i32
    return %c0_i32, %c0_i32_0 : i32, i32
  }
  func.func @transform_6(%arg0: i32) -> (i32, i32) {
    %c0_i32 = arith.constant 0 : i32
    %c0_i32_0 = arith.constant 0 : i32
    %c0_i32_1 = arith.constant 0 : i32
    return %c0_i32, %c0_i32_0 : i32, i32
  }
  func.func @transform_7(%arg0: i32) -> (i32, i32) {
    %c0_i32 = arith.constant 0 : i32
    %c0_i32_0 = arith.constant 0 : i32
    return %arg0, %c0_i32 : i32, i32
  }
}

</mosaic_0001>

<bundles_post_ra>
// kernel: tpu_custom_call.1
= control target key start
LH: loop header
LB: loop body
LE: loop exit
PB: predicated region body
PF: predicated region fallthrough
CT: control target
= control target key end

     0   :  { %13 = vsyncpa [#allocation4], 0  ;;  %s483_s0 = inlined_call_operand.hbm [shape: f32[8,16], index: 0, kind: input, shape index: {}]   ;;  %s484_s1 = inlined_call_operand.hbm [shape: f32[16,32], index: 1, kind: input, shape index: {}]   ;;  %s485_s2 = inlined_call_operand.vmem [shape: f32[1,32], index: 2, kind: input, shape index: {}]   ;;  %s486_s3 = inlined_call_operand.hbm [shape: f32[32,64], index: 3, kind: input, shape index: {}]   ;;  %s487_s4 = inlined_call_operand.vmem [shape: f32[1,64], index: 4, kind: input, shape index: {}]   ;;  %s488_s5 = inlined_call_operand.vmem [shape: f32[1,64], index: 5, kind: input, shape index: {}]   ;;  %s489_s6 = inlined_call_operand.<no memory space> [shape: f32[1,1], index: 6, kind: input, shape index: {}]   ;;  %s490_s7 = inlined_call_operand.vmem [shape: f32[8,1], index: 7, kind: output, shape index: {}]  }
   0x1   :  { %14 = vsyncpa [#allocation6], 0  ;;  %s378_s24 = smov [#allocation5]   ;;  %s308_s28 = scalar_lea.hbm %s484_s1, 256 }
   0x2   :  { %s30_s25 = sshll.u32 %s378_s24, 4  ;;  %p309_p0 = scmp.ne.s32.totalorder %s484_s1, %s308_s28  ;;  %s31_s25 = int_to_ptr.vmem [resolvable:$true] %s30_s25 }
   0x3   :  { %p312_p1 = scmp.lt.u32.totalorder %s308_s28, %s484_s1 }
   0x5   :  { %p314_p2 = pnand %p312_p1, %p309_p0 }
   0x7   :  { %317 = shalt.err (!%p314_p2)
}
   0x8   :  { %s318_s10 = scalar_lea.vmem %s31_s25, 256  ;;  %p323_p4 = scmp.lt.s32.totalorder %s31_s25, %s31_s25 }
   0x9   :  { %p319_p3 = scmp.ne.s32.totalorder %s31_s25, %s318_s10  ;;  %p324_p5 = scmp.lt.s32.totalorder %s318_s10, %s318_s10 }
   0xb   :  { %p325_p6 = por %p324_p5, %p323_p4 }
   0xd   :  { %p326_p7 = pnand %p325_p6, %p319_p3 }
   0xf   :  { %329 = shalt.err (!%p326_p7)
}
  0x10   :  { %s379_s11 = smov 128   ;;  %s380_s12 = smov 8  }
  0x11   :  { %36 = dma.hbm_to_vmem [thread:$0]  %s484_s1, 256, %s31_s25, [#allocation6], %s379_s11, %s379_s11, %s380_s12  }
  0x12   :  { %s381_s15 = smov [#allocation3]   ;;  %s382_s17 = smov [#allocation7]  }
  0x13   :  { %s21_s16 = sshll.u32 %s381_s15, 4  ;;  %s44_s18 = sshll.u32 %s382_s17, 4  ;;  %s22_s16 = int_to_ptr.vmem [resolvable:$true] %s21_s16  ;;  %s45_s18 = int_to_ptr.vmem [resolvable:$true] %s44_s18 }
  0x14   :  { %s330_s21 = scalar_lea.hbm %s483_s0, 128 }
  0x15   :  { %p331_p8 = scmp.ne.s32.totalorder %s483_s0, %s330_s21  ;;  %p334_p9 = scmp.lt.u32.totalorder %s330_s21, %s483_s0 }
  0x17   :  { %p336_p10 = pnand %p334_p9, %p331_p8 }
  0x19   :  { %339 = shalt.err (!%p336_p10)
}
  0x1a   :  { %s340_s1 = scalar_lea.vmem %s22_s16, 128  ;;  %p345_p12 = scmp.lt.s32.totalorder %s22_s16, %s22_s16 }
  0x1b   :  { %p341_p11 = scmp.ne.s32.totalorder %s22_s16, %s340_s1  ;;  %p346_p13 = scmp.lt.s32.totalorder %s340_s1, %s340_s1 }
  0x1d   :  { %p347_p0 = por %p346_p13, %p345_p12 }
  0x1f   :  { %p348_p1 = pnand %p347_p0, %p341_p11 }
  0x21   :  { %351 = shalt.err (!%p348_p1)
}
  0x22   :  { %24 = dma.hbm_to_vmem [thread:$0]  %s483_s0, 128, %s22_s16, [#allocation4]  }
  0x23   :  { %s352_s30 = scalar_lea.hbm %s486_s3, 512 }
  0x24   :  { %p353_p2 = scmp.ne.s32.totalorder %s486_s3, %s352_s30  ;;  %p356_p3 = scmp.lt.u32.totalorder %s352_s30, %s486_s3 }
  0x26   :  { %p358_p4 = pnand %p356_p3, %p353_p2 }
  0x28   :  { %361 = shalt.err (!%p358_p4)
}
  0x29   :  { %s362_s14 = scalar_lea.vmem %s45_s18, 512  ;;  %p367_p6 = scmp.lt.s32.totalorder %s45_s18, %s45_s18 }
  0x2a   :  { %p363_p5 = scmp.ne.s32.totalorder %s45_s18, %s362_s14  ;;  %p368_p7 = scmp.lt.s32.totalorder %s362_s14, %s362_s14 }
  0x2c   :  { %p369_p8 = por %p368_p7, %p367_p6 }
  0x2e   :  { %p370_p9 = pnand %p369_p8, %p363_p5 }
  0x30   :  { %373 = shalt.err (!%p370_p9)
}
  0x31   :  { %50 = dma.hbm_to_vmem [thread:$0]  %s486_s3, 512, %s45_s18, [#allocation6], %s379_s11, %s379_s11, %s380_s12  }
  0x32   :  { %374 = dma.done.wait [#allocation4], 128  }
  0x33   :  { %375 = vsyncadd [#allocation4], 4294967168 }
  0x34   :  { %376 = dma.done.wait [#allocation6], 768  }
  0x35   :  { %377 = vsyncadd [#allocation6], 4294966528  ;;  %v383_v0 = vmov 0.0|0.0   ;;  %vm384_vm0 = vmmov 0   ;;  %v385_v1 = vmov 0.0   ;;  %v67_v2 = vld [vmem:[#allocation5] sm:$0xff]  ;;  %v250_v25 = vstv %s489_s6 }
  0x36   :  { %291 = vmatprep.subr.bf16.mxu0 %v383_v0  ;;  %277 = vmatprep.mubr.msk.f32.mxu0 %vm384_vm0, %v385_v1  ;;  %v68_v3 = vld [vmem:[#allocation5 + $0x8] sm:$0xff]  ;;  %v151_v5 = vld [vmem:[#allocation7] sm:$0xff]  ;;  %v152_v6 = vld [vmem:[#allocation7 + $0x8] sm:$0xff]  ;;  %vm76_vm1 = vcmask 130048   ;;  %vm162_vm2 = vcmask 261120   ;;  %vm245_vm3 = vcmask 523264  }
  0x37   :  { %294 = vmatprep.subr.bf16.mxu1 %v383_v0  ;;  %288 = vmatprep.mubr.msk.f32.mxu1 %vm384_vm0, %v385_v1  ;;  %v292_v4 = vpack.c.bf16 %v68_v3, %v67_v2  ;;  %v295_v7 = vpack.c.bf16 %v152_v6, %v151_v5  ;;  %v66_v8 = vld [vmem:[#allocation3] sm:$0xff]  ;;  %v153_v9 = vld [vmem:[#allocation7 + $0x10] sm:$0xff]  ;;  %v154_v10 = vld [vmem:[#allocation7 + $0x18] sm:$0xff]  ;;  %vm252_vm4 = vcmask 7168  }
  0x38   :  { %v298_v11 = vpack.c.bf16 %v154_v10, %v153_v9  ;;  %v260_v12 = vld [vmem:[%s485_s2] ss:$0 sm:$0xff] }
  0x39   :  { %293 = vmatpush3.bf16.msra.mxu0 %v292_v4  ;;  %296 = vmatpush3.bf16.msra.mxu1 %v295_v7  ;;  %v262_v17 = vld [vmem:[%s487_s4] ss:$0 sm:$0xff] }
  0x3a   :  { %297 = vmatprep.subr.bf16.mxu1 %v383_v0  ;;  %v264_v21 = vld [vmem:[%s488_s5] ss:$0 sm:$0xff] }
  0x3c   :  { %278 = vmatmul.mubr.msk.f32.vlgmr.msra.gmra.mrb[0].mxu0 %vm76_vm1, %v66_v8 }
  0x3d   :  { %299 = vmatpush3.bf16.msra.mxu1 %v298_v11 }
 0x10f   :  { %v146_v13 = vpop.f32.mrb[0].mxu0 }
 0x110   :  { %v147_v14 = vadd.f32 %v260_v12, %v146_v13  ;;  %v279_v15 = vpop.f32.mrb[1].mxu0 }
 0x112   :  { %v150_v16 = vmax.f32 %v147_v14, 0.0 }
 0x114   :  { %289 = vmatmul.mubr.msk.f32.vlgmr.msra.gmra.mrb[0].mxu1 %vm162_vm2, %v150_v16 }
 0x1e7   :  { %v232_v18 = vpop.f32.mrb[0].mxu1 }
 0x1e8   :  { %v233_v19 = vadd.f32 %v262_v17, %v232_v18  ;;  %v290_v20 = vpop.f32.mrb[1].mxu1 }
 0x1ea   :  { %v236_v22 = vmax.f32 %v233_v19, 0.0 }
 0x1ec   :  { %v244_v23 = vmul.f32 %v264_v21, %v236_v22 }
 0x1ee   :  { %v246_v24 = vsel %vm245_vm3, %v244_v23, 0.0 }
 0x1ef   :  { %247 = vadd.xlane.f32.xlu0 %v246_v24 }
 0x27c   :  { %v248_v26 = vpop.xlane.xlu0 %247 }
 0x27d   :  { %v251_v27 = vadd.f32 %v250_v25, %v248_v26 }
 0x27f   :  { %253 = vst.msk [vmem:[%s490_s7] sm:$0xff] %vm252_vm4, %v251_v27 }
 0x280   :  { %258 = vsyncpa [#allocation4], 1 }
 0x281   :  { %259 = vsyncpa [#allocation6], 1 }

</bundles_post_ra>
